<compile_context>
chip_gen: v7x
topology: tpu7x:2x2x1
jax: 0.10.0
libtpu: 0.0.40
codegen_flags: <defaults>
</compile_context>

<pallas_src>
import jax
import jax.numpy as jnp
from jax.experimental import pallas as pl
from jax.experimental.pallas import tpu as pltpu

LANE = 128
SUBLANE = 8
MAX_BATCH_TILE = 1024  # big tiles amortize the ~0.35us per-grid-step cost


def _round_up(x, m):
    return ((x + m - 1) // m) * m


def fused_cls_mlp_kernel(ids_ref, seg_ref, mask_ref,
                         tok_emb_ref, seg_emb_ref, pos0_ref,
                         w1_ref, b1_ref, w2_ref, b2_ref, w3_ref, b3_ref,
                         o_ref):
    """Fused CLS-embedding stub + MLP (Linear->ReLU->Linear->ReLU->Dropout(id)->Linear).

    All weights/embeddings are VMEM-resident (constant index_map); activations are
    bf16 on the MXU with f32 accumulation; only the final output is stored (lane-dense,
    128 columns).
    """
    tm = ids_ref.shape[0]

    # ---- CLS token of the stub backbone: tok_emb[ids[:,0]] + seg_emb[seg[:,0]] + pos_emb[0]
    ids = ids_ref[:, 0:1]                         # (tm, 1) int32
    segs = seg_ref[:, 0:1]                        # (tm, 1) int32
    mask = mask_ref[:, 0:1].astype(jnp.float32)   # (tm, 1)

    vocab_pad = tok_emb_ref.shape[0]
    # Token-embedding gather as a one-hot matmul (MXU) -> no dynamic gather needed.
    onehot = (ids == jax.lax.broadcasted_iota(jnp.int32, (tm, vocab_pad), 1)
              ).astype(jnp.float32)
    cls = jnp.dot(onehot, tok_emb_ref[...], preferred_element_type=jnp.float32)
    # Segment embedding has only two rows -> select instead of gather.
    cls = cls + jnp.where(segs == 0, seg_emb_ref[0:1, :], seg_emb_ref[1:2, :])
    cls = cls + pos0_ref[...]
    # TODO(synk): mask-multiply is part of the stub; a real XLNet applies the mask
    # inside attention, not on the hidden state.
    cls = cls * mask
    x = cls.astype(jnp.bfloat16)                  # bf16 MXU inputs, f32 accumulation

    # ---- MLP: Linear -> ReLU -> Linear -> ReLU -> Dropout(eval: identity) -> Linear
    h = jnp.dot(x, w1_ref[...], preferred_element_type=jnp.float32) + b1_ref[...]
    h = jnp.maximum(h, 0.0).astype(jnp.bfloat16)
    h = jnp.dot(h, w2_ref[...], preferred_element_type=jnp.float32) + b2_ref[...]
    h = jnp.maximum(h, 0.0).astype(jnp.bfloat16)
    # TODO(synk): train-mode dropout (pltpu.prng_seed / prng_random_bits) not implemented.
    o = jnp.dot(h, w3_ref[...], preferred_element_type=jnp.float32) + b3_ref[...]
    o_ref[...] = o.astype(o_ref.dtype)


def llm_baseline_forward(input_ids, attention_mask, token_type_ids, labels,
                         params, mlp_output_dim):
    """Matches LLM_Baseline.forward: returns mlp(cls_token) of shape (B, mlp_output_dim)."""
    del labels  # unused in the PyTorch forward path that produces mlp_output
    tok_emb = params["tok_emb"]          # (VOCAB_PAD, D_in) f32
    seg_emb = params["seg_emb"]          # (2, D_in)  f32
    pos0 = params["pos0"]                # (1, D_in)  f32
    (w1, b1), (w2, b2), (w3, b3) = params["mlp"]

    B, S = input_ids.shape
    o_pad = w3.shape[1]

    # No batch padding: small B -> single full-array block; large B -> 1024-row tiles
    # with a cdiv grid (Pallas handles the partial last tile).
    tm = B if B <= MAX_BATCH_TILE else MAX_BATCH_TILE
    grid = (pl.cdiv(B, tm),)

    batch_map = lambda i: (i, 0)     # batch-tiled operands
    const_map = lambda i: (0, 0)     # VMEM-resident weights / embeddings

    out = pl.pallas_call(
        fused_cls_mlp_kernel,
        out_shape=jax.ShapeDtypeStruct((B, o_pad), jnp.float32),
        grid_spec=pltpu.PrefetchScalarGridSpec(
            num_scalar_prefetch=0,
            grid=grid,
            in_specs=[
                pl.BlockSpec((tm, S), batch_map),          # input_ids
                pl.BlockSpec((tm, S), batch_map),          # token_type_ids
                pl.BlockSpec((tm, S), batch_map),          # attention_mask
                pl.BlockSpec(tok_emb.shape, const_map),    # token embedding table
                pl.BlockSpec(seg_emb.shape, const_map),    # segment embedding table
                pl.BlockSpec(pos0.shape, const_map),       # position-0 embedding
                pl.BlockSpec(w1.shape, const_map),
                pl.BlockSpec(b1.shape, const_map),
                pl.BlockSpec(w2.shape, const_map),
                pl.BlockSpec(b2.shape, const_map),
                pl.BlockSpec(w3.shape, const_map),
                pl.BlockSpec(b3.shape, const_map),
            ],
            out_specs=pl.BlockSpec((tm, o_pad), batch_map),
        ),
        compiler_params=pltpu.CompilerParams(
            dimension_semantics=("parallel",),   # both TCs on v7x when grid >= 2
        ),
    )(input_ids, token_type_ids, attention_mask,
      tok_emb, seg_emb, pos0, w1, b1, w2, b2, w3, b3)
    return out[:, :mlp_output_dim]


def init_linear(key, in_dim, out_dim, out_pad):
    """nn.Linear init U(-1/sqrt(fan_in), 1/sqrt(fan_in)).

    Weight stored transposed (in_dim, out_pad) in bf16 with zero-padded lane columns
    (K left unpadded); bias (1, out_pad) f32 with zero-padded columns.
    """
    kw, kb = jax.random.split(key)
    bound = 1.0 / (in_dim ** 0.5)
    w = jax.random.uniform(kw, (in_dim, out_dim), jnp.float32, -bound, bound)
    b = jax.random.uniform(kb, (out_dim,), jnp.float32, -bound, bound)
    w_p = jnp.zeros((in_dim, out_pad), jnp.bfloat16).at[:, :out_dim].set(
        w.astype(jnp.bfloat16))
    b_p = jnp.zeros((1, out_pad), jnp.float32).at[0, :out_dim].set(b)
    return w_p, b_p


if __name__ == "__main__":
    # Small shapes consistent with the module:
    #   batch=2, seq=8, bert_cls_dim == fc_output_dim == 32 (MLP input dim),
    #   mlp_hidden_dim=[64, 64], mlp_output_dim=4.
    B, S, VOCAB = 2, 8, 50
    BERT_CLS_DIM = 32
    MLP_HIDDEN = [64, 64]
    MLP_OUT = 4

    VOCAB_PAD = _round_up(VOCAB, SUBLANE)     # 56 (zero rows never selected)
    O_PAD = _round_up(MLP_OUT, LANE)          # 128 (lane-dense output store)

    root = jax.random.PRNGKey(0)
    k_tok, k_seg, k_pos, k_l1, k_l2, k_l3, k_ids = jax.random.split(root, 7)

    tok_emb = jnp.zeros((VOCAB_PAD, BERT_CLS_DIM), jnp.float32).at[:VOCAB].set(
        0.02 * jax.random.normal(k_tok, (VOCAB, BERT_CLS_DIM), jnp.float32))
    seg_emb = 0.02 * jax.random.normal(k_seg, (2, BERT_CLS_DIM), jnp.float32)
    pos_emb = 0.02 * jax.random.normal(k_pos, (S, BERT_CLS_DIM), jnp.float32)

    params = {
        "tok_emb": tok_emb,
        "seg_emb": seg_emb,
        "pos0": pos_emb[0:1, :],   # only the CLS position is consumed downstream
        "mlp": [
            init_linear(k_l1, BERT_CLS_DIM, MLP_HIDDEN[0], MLP_HIDDEN[0]),
            init_linear(k_l2, MLP_HIDDEN[0], MLP_HIDDEN[1], MLP_HIDDEN[1]),
            init_linear(k_l3, MLP_HIDDEN[1], MLP_OUT, O_PAD),
        ],
    }

    input_ids = jax.random.randint(k_ids, (B, S), 0, VOCAB, dtype=jnp.int32)
    attention_mask = jnp.ones((B, S), dtype=jnp.int32)
    token_type_ids = jnp.zeros((B, S), dtype=jnp.int32)
    labels = jnp.zeros((B,), dtype=jnp.int32)

    out = llm_baseline_forward(input_ids, attention_mask, token_type_ids, labels,
                               params, MLP_OUT)
    out = jax.block_until_ready(out)

    # Pure-JAX reference (same stub + same bf16-stored weights) for a sanity check.
    def reference():
        (w1, b1), (w2, b2), (w3, b3) = params["mlp"]
        cls = (tok_emb[input_ids[:, 0]]
               + jnp.where(token_type_ids[:, 0:1] == 0, seg_emb[0], seg_emb[1])
               + pos_emb[0][None, :])
        cls = cls * attention_mask[:, 0:1].astype(jnp.float32)
        h = jnp.maximum(cls @ w1.astype(jnp.float32) + b1, 0.0)
        h = jnp.maximum(h @ w2.astype(jnp.float32) + b2, 0.0)
        return (h @ w3.astype(jnp.float32) + b3)[:, :MLP_OUT]

    ref = reference()
    assert out.shape == (B, MLP_OUT), out.shape
    assert bool(jnp.all(jnp.isfinite(out)))
    assert bool(jnp.allclose(out, ref, atol=2e-2, rtol=2e-2)), (out, ref)
    print("KERNEL_OK")
</pallas_src>

<mosaic_0001>
module attributes {stable_mosaic.version = 11 : i64} {
  func.func @fused_cls_mlp_kernel(%arg0: i32, %arg1: memref<2x8xi32, #tpu.memory_space<vmem>>, %arg2: memref<2x8xi32, #tpu.memory_space<vmem>>, %arg3: memref<2x8xi32, #tpu.memory_space<vmem>>, %arg4: memref<56x32xf32, #tpu.memory_space<vmem>>, %arg5: memref<2x32xf32, #tpu.memory_space<vmem>>, %arg6: memref<1x32xf32, #tpu.memory_space<vmem>>, %arg7: memref<32x64xbf16, #tpu.memory_space<vmem>>, %arg8: memref<1x64xf32, #tpu.memory_space<vmem>>, %arg9: memref<64x64xbf16, #tpu.memory_space<vmem>>, %arg10: memref<1x64xf32, #tpu.memory_space<vmem>>, %arg11: memref<64x128xbf16, #tpu.memory_space<vmem>>, %arg12: memref<1x128xf32, #tpu.memory_space<vmem>>, %arg13: memref<2x128xf32, #tpu.memory_space<vmem>>) attributes {dimension_semantics = [#tpu.dimension_semantics<parallel>], iteration_bounds = array<i64: 1>, scalar_prefetch = 0 : i64, scratch_operands = 0 : i64, tpu.core_type = #tpu.core_type<tc>, window_params = [{transform_indices = @transform_0, window_bounds = array<i64: 2, 8>}, {transform_indices = @transform_1, window_bounds = array<i64: 2, 8>}, {transform_indices = @transform_2, window_bounds = array<i64: 2, 8>}, {pipeline_mode = #tpu.pipeline_mode<synchronous>, transform_indices = @transform_3, window_bounds = array<i64: 56, 32>}, {pipeline_mode = #tpu.pipeline_mode<synchronous>, transform_indices = @transform_4, window_bounds = array<i64: 2, 32>}, {pipeline_mode = #tpu.pipeline_mode<synchronous>, transform_indices = @transform_5, window_bounds = array<i64: 1, 32>}, {pipeline_mode = #tpu.pipeline_mode<synchronous>, transform_indices = @transform_6, window_bounds = array<i64: 32, 64>}, {pipeline_mode = #tpu.pipeline_mode<synchronous>, transform_indices = @transform_7, window_bounds = array<i64: 1, 64>}, {pipeline_mode = #tpu.pipeline_mode<synchronous>, transform_indices = @transform_8, window_bounds = array<i64: 64, 64>}, {pipeline_mode = #tpu.pipeline_mode<synchronous>, transform_indices = @transform_9, window_bounds = array<i64: 1, 64>}, {pipeline_mode = #tpu.pipeline_mode<synchronous>, transform_indices = @transform_10, window_bounds = array<i64: 64, 128>}, {pipeline_mode = #tpu.pipeline_mode<synchronous>, transform_indices = @transform_11, window_bounds = array<i64: 1, 128>}, {transform_indices = @transform_12, window_bounds = array<i64: 2, 128>}]} {
    %c0 = arith.constant 0 : index
    %c0_0 = arith.constant 0 : index
    %0 = vector.load %arg1[%c0, %c0_0] : memref<2x8xi32, #tpu.memory_space<vmem>>, vector<2x1xi32>
    %c0_1 = arith.constant 0 : index
    %c0_2 = arith.constant 0 : index
    %1 = vector.load %arg2[%c0_1, %c0_2] : memref<2x8xi32, #tpu.memory_space<vmem>>, vector<2x1xi32>
    %c0_3 = arith.constant 0 : index
    %c0_4 = arith.constant 0 : index
    %2 = vector.load %arg3[%c0_3, %c0_4] : memref<2x8xi32, #tpu.memory_space<vmem>>, vector<2x1xi32>
    %3 = arith.sitofp %2 : vector<2x1xi32> to vector<2x1xf32>
    %4 = tpu.iota {dimensions = array<i32: 1>} : vector<2x56xi32>
    %5 = vector.broadcast %0 : vector<2x1xi32> to vector<2x56xi32>
    %6 = arith.cmpi eq, %5, %4 : vector<2x56xi32>
    %7 = arith.extui %6 : vector<2x56xi1> to vector<2x56xi32>
    %8 = arith.sitofp %7 : vector<2x56xi32> to vector<2x56xf32>
    %c0_5 = arith.constant 0 : index
    %c0_6 = arith.constant 0 : index
    %9 = vector.load %arg4[%c0_5, %c0_6] : memref<56x32xf32, #tpu.memory_space<vmem>>, vector<56x32xf32>
    %cst = arith.constant dense<0.000000e+00> : vector<2x32xf32>
    %10 = tpu.matmul %8, %9, %cst {dimension_numbers = #tpu.dot_dimension_numbers<[1], [0], [0], [1], [0, 0, 1, 1], [], []>} : vector<2x56xf32>, vector<56x32xf32>, vector<2x32xf32> -> vector<2x32xf32>
    %c0_i32 = arith.constant 0 : i32
    %11 = vector.broadcast %c0_i32 : i32 to vector<2x1xi32>
    %12 = arith.cmpi eq, %1, %11 : vector<2x1xi32>
    %c0_7 = arith.constant 0 : index
    %c0_8 = arith.constant 0 : index
    %13 = vector.load %arg5[%c0_7, %c0_8] : memref<2x32xf32, #tpu.memory_space<vmem>>, vector<1x32xf32>
    %c1 = arith.constant 1 : index
    %c0_9 = arith.constant 0 : index
    %14 = vector.load %arg5[%c1, %c0_9] : memref<2x32xf32, #tpu.memory_space<vmem>>, vector<1x32xf32>
    %15 = vector.shape_cast %12 : vector<2x1xi1> to vector<2x1xi1>
    %16 = vector.broadcast %15 : vector<2x1xi1> to vector<2x32xi1>
    %17 = vector.shape_cast %13 : vector<1x32xf32> to vector<1x32xf32>
    %18 = vector.broadcast %17 : vector<1x32xf32> to vector<2x32xf32>
    %19 = vector.shape_cast %14 : vector<1x32xf32> to vector<1x32xf32>
    %20 = vector.broadcast %19 : vector<1x32xf32> to vector<2x32xf32>
    %21 = arith.select %16, %18, %20 : vector<2x32xi1>, vector<2x32xf32>
    %22 = arith.addf %10, %21 : vector<2x32xf32>
    %c0_10 = arith.constant 0 : index
    %c0_11 = arith.constant 0 : index
    %23 = vector.load %arg6[%c0_10, %c0_11] : memref<1x32xf32, #tpu.memory_space<vmem>>, vector<1x32xf32>
    %24 = vector.broadcast %23 : vector<1x32xf32> to vector<2x32xf32>
    %25 = arith.addf %22, %24 : vector<2x32xf32>
    %26 = vector.broadcast %3 : vector<2x1xf32> to vector<2x32xf32>
    %27 = arith.mulf %25, %26 : vector<2x32xf32>
    %28 = arith.truncf %27 : vector<2x32xf32> to vector<2x32xbf16>
    %c0_12 = arith.constant 0 : index
    %c0_13 = arith.constant 0 : index
    %29 = vector.load %arg7[%c0_12, %c0_13] : memref<32x64xbf16, #tpu.memory_space<vmem>>, vector<32x64xbf16>
    %cst_14 = arith.constant dense<0.000000e+00> : vector<2x64xf32>
    %30 = tpu.matmul %28, %29, %cst_14 {dimension_numbers = #tpu.dot_dimension_numbers<[1], [0], [0], [1], [0, 0, 1, 1], [], []>} : vector<2x32xbf16>, vector<32x64xbf16>, vector<2x64xf32> -> vector<2x64xf32>
    %c0_15 = arith.constant 0 : index
    %c0_16 = arith.constant 0 : index
    %31 = vector.load %arg8[%c0_15, %c0_16] : memref<1x64xf32, #tpu.memory_space<vmem>>, vector<1x64xf32>
    %32 = vector.broadcast %31 : vector<1x64xf32> to vector<2x64xf32>
    %33 = arith.addf %30, %32 : vector<2x64xf32>
    %cst_17 = arith.constant 0.000000e+00 : f32
    %34 = vector.broadcast %cst_17 : f32 to vector<2x64xf32>
    %35 = arith.maximumf %33, %34 : vector<2x64xf32>
    %36 = arith.truncf %35 : vector<2x64xf32> to vector<2x64xbf16>
    %c0_18 = arith.constant 0 : index
    %c0_19 = arith.constant 0 : index
    %37 = vector.load %arg9[%c0_18, %c0_19] : memref<64x64xbf16, #tpu.memory_space<vmem>>, vector<64x64xbf16>
    %cst_20 = arith.constant dense<0.000000e+00> : vector<2x64xf32>
    %38 = tpu.matmul %36, %37, %cst_20 {dimension_numbers = #tpu.dot_dimension_numbers<[1], [0], [0], [1], [0, 0, 1, 1], [], []>} : vector<2x64xbf16>, vector<64x64xbf16>, vector<2x64xf32> -> vector<2x64xf32>
    %c0_21 = arith.constant 0 : index
    %c0_22 = arith.constant 0 : index
    %39 = vector.load %arg10[%c0_21, %c0_22] : memref<1x64xf32, #tpu.memory_space<vmem>>, vector<1x64xf32>
    %40 = vector.broadcast %39 : vector<1x64xf32> to vector<2x64xf32>
    %41 = arith.addf %38, %40 : vector<2x64xf32>
    %cst_23 = arith.constant 0.000000e+00 : f32
    %42 = vector.broadcast %cst_23 : f32 to vector<2x64xf32>
    %43 = arith.maximumf %41, %42 : vector<2x64xf32>
    %44 = arith.truncf %43 : vector<2x64xf32> to vector<2x64xbf16>
    %c0_24 = arith.constant 0 : index
    %c0_25 = arith.constant 0 : index
    %45 = vector.load %arg11[%c0_24, %c0_25] : memref<64x128xbf16, #tpu.memory_space<vmem>>, vector<64x128xbf16>
    %cst_26 = arith.constant dense<0.000000e+00> : vector<2x128xf32>
    %46 = tpu.matmul %44, %45, %cst_26 {dimension_numbers = #tpu.dot_dimension_numbers<[1], [0], [0], [1], [0, 0, 1, 1], [], []>} : vector<2x64xbf16>, vector<64x128xbf16>, vector<2x128xf32> -> vector<2x128xf32>
    %c0_27 = arith.constant 0 : index
    %c0_28 = arith.constant 0 : index
    %47 = vector.load %arg12[%c0_27, %c0_28] : memref<1x128xf32, #tpu.memory_space<vmem>>, vector<1x128xf32>
    %48 = vector.broadcast %47 : vector<1x128xf32> to vector<2x128xf32>
    %49 = arith.addf %46, %48 : vector<2x128xf32>
    %c0_29 = arith.constant 0 : index
    %c0_30 = arith.constant 0 : index
    %50 = vector.load %arg13[%c0_29, %c0_30] : memref<2x128xf32, #tpu.memory_space<vmem>>, vector<2x128xf32>
    tpu.vector_store %arg13[%c0_29, %c0_30], %49 {strides = array<i32>} : memref<2x128xf32, #tpu.memory_space<vmem>>, vector<2x128xf32>,
    return
  }
  func.func @transform_0(%arg0: i32) -> (i32, i32) {
    %c0_i32 = arith.constant 0 : i32
    %c0_i32_0 = arith.constant 0 : i32
    return %arg0, %c0_i32 : i32, i32
  }
  func.func @transform_1(%arg0: i32) -> (i32, i32) {
    %c0_i32 = arith.constant 0 : i32
    %c0_i32_0 = arith.constant 0 : i32
    return %arg0, %c0_i32 : i32, i32
  }
  func.func @transform_2(%arg0: i32) -> (i32, i32) {
    %c0_i32 = arith.constant 0 : i32
    %c0_i32_0 = arith.constant 0 : i32
    return %arg0, %c0_i32 : i32, i32
  }
  func.func @transform_3(%arg0: i32) -> (i32, i32) {
    %c0_i32 = arith.constant 0 : i32
    %c0_i32_0 = arith.constant 0 : i32
    %c0_i32_1 = arith.constant 0 : i32
    return %c0_i32, %c0_i32_0 : i32, i32
  }
  func.func @transform_4(%arg0: i32) -> (i32, i32) {
    %c0_i32 = arith.constant 0 : i32
    %c0_i32_0 = arith.constant 0 : i32
    %c0_i32_1 = arith.constant 0 : i32
    return %c0_i32, %c0_i32_0 : i32, i32
  }
  func.func @transform_5(%arg0: i32) -> (i32, i32) {
    %c0_i32 = arith.constant 0 : i32
    %c0_i32_0 = arith.constant 0 : i32
    %c0_i32_1 = arith.constant 0 : i32
    return %c0_i32, %c0_i32_0 : i32, i32
  }
  func.func @transform_6(%arg0: i32) -> (i32, i32) {
    %c0_i32 = arith.constant 0 : i32
    %c0_i32_0 = arith.constant 0 : i32
    %c0_i32_1 = arith.constant 0 : i32
    return %c0_i32, %c0_i32_0 : i32, i32
  }
  func.func @transform_7(%arg0: i32) -> (i32, i32) {
    %c0_i32 = arith.constant 0 : i32
    %c0_i32_0 = arith.constant 0 : i32
    %c0_i32_1 = arith.constant 0 : i32
    return %c0_i32, %c0_i32_0 : i32, i32
  }
  func.func @transform_8(%arg0: i32) -> (i32, i32) {
    %c0_i32 = arith.constant 0 : i32
    %c0_i32_0 = arith.constant 0 : i32
    %c0_i32_1 = arith.constant 0 : i32
    return %c0_i32, %c0_i32_0 : i32, i32
  }
  func.func @transform_9(%arg0: i32) -> (i32, i32) {
    %c0_i32 = arith.constant 0 : i32
    %c0_i32_0 = arith.constant 0 : i32
    %c0_i32_1 = arith.constant 0 : i32
    return %c0_i32, %c0_i32_0 : i32, i32
  }
  func.func @transform_10(%arg0: i32) -> (i32, i32) {
    %c0_i32 = arith.constant 0 : i32
    %c0_i32_0 = arith.constant 0 : i32
    %c0_i32_1 = arith.constant 0 : i32
    return %c0_i32, %c0_i32_0 : i32, i32
  }
  func.func @transform_11(%arg0: i32) -> (i32, i32) {
    %c0_i32 = arith.constant 0 : i32
    %c0_i32_0 = arith.constant 0 : i32
    %c0_i32_1 = arith.constant 0 : i32
    return %c0_i32, %c0_i32_0 : i32, i32
  }
  func.func @transform_12(%arg0: i32) -> (i32, i32) {
    %c0_i32 = arith.constant 0 : i32
    %c0_i32_0 = arith.constant 0 : i32
    return %arg0, %c0_i32 : i32, i32
  }
}

</mosaic_0001>

<bundles_post_ra>
// kernel: tpu_custom_call.1
= control target key start
LH: loop header
LB: loop body
LE: loop exit
PB: predicated region body
PF: predicated region fallthrough
CT: control target
= control target key end

     0   :  { %v560_v2 = vmov 0   ;;  %v561_v3 = vmov 0.0|0.0   ;;  %vm562_vm1 = vmmov 0   ;;  %v563_v12 = vmov 0.0   ;;  %s742_s0 = inlined_call_operand.vmem [shape: s32[2,8], index: 0, kind: input, shape index: {}]   ;;  %s743_s1 = inlined_call_operand.vmem [shape: s32[2,8], index: 1, kind: input, shape index: {}]   ;;  %s744_s2 = inlined_call_operand.vmem [shape: s32[2,8], index: 2, kind: input, shape index: {}]   ;;  %s745_s3 = inlined_call_operand.vmem [shape: f32[56,32], index: 3, kind: input, shape index: {}]   ;;  %s746_s4 = inlined_call_operand.vmem [shape: f32[2,32], index: 4, kind: input, shape index: {}]   ;;  %s747_s5 = inlined_call_operand.vmem [shape: f32[1,32], index: 5, kind: input, shape index: {}]   ;;  %s748_s6 = inlined_call_operand.vmem [shape: bf16[32,64], index: 6, kind: input, shape index: {}]   ;;  %s749_s7 = inlined_call_operand.vmem [shape: f32[1,64], index: 7, kind: input, shape index: {}]   ;;  %s750_s8 = inlined_call_operand.vmem [shape: bf16[64,64], index: 8, kind: input, shape index: {}]   ;;  %s751_s9 = inlined_call_operand.vmem [shape: f32[1,64], index: 9, kind: input, shape index: {}]   ;;  %s752_s10 = inlined_call_operand.vmem [shape: bf16[64,128], index: 10, kind: input, shape index: {}]   ;;  %s753_s11 = inlined_call_operand.vmem [shape: f32[1,128], index: 11, kind: input, shape index: {}]   ;;  %s754_s12 = inlined_call_operand.hbm [shape: f32[2,128], index: 12, kind: output, shape index: {}]  }
   0x1   :  { %v43_v0 = vld [vmem:[%s742_s0] sm:$0x3]  ;;  %524 = vset.pattern.permute.xlu0 %v560_v2  ;;  %510 = vmatprep.subr.bf16.mxu0 %v561_v3  ;;  %v56_v5 = vld [vmem:[%s745_s3 + $0x8] sm:$0xff]  ;;  %v57_v6 = vld [vmem:[%s745_s3 + $0x10] sm:$0xff] }
   0x2   :  { %v44_v1 = vld [vmem:[%s743_s1] sm:$0x3]  ;;  %50 = vperm.xlu0 %524, %v43_v0   ;;  %v58_v8 = vld [vmem:[%s745_s3 + $0x18] sm:$0xff]  ;;  %525 = vset.pattern.permute.xlu1 %v560_v2  ;;  %v60_v11 = vld [vmem:[%s745_s3 + $0x28] sm:$0xff] }
   0x3   :  { %vm62_vm0 = vcmp.eq.s32.totalorder %v44_v1, 0  ;;  %v55_v4 = vld [vmem:[%s745_s3] sm:$0xff]  ;;  %475 = vmatprep.mubr.msk.f32.mxu0 %vm562_vm1, %v563_v12  ;;  %478 = vmatprep.subr.bf16.mxu1 %v563_v12  ;;  %v514_v13 = vpack.c.bf16 %v58_v8, %v57_v6 }
   0x4   :  { %v511_v7 = vpack.c.bf16 %v56_v5, %v55_v4  ;;  %v65_v9 = vsel %vm62_vm0, 1, %v560_v2  ;;  %v59_v10 = vld [vmem:[%s745_s3 + $0x20] sm:$0xff]  ;;  %482 = vmatprep.mubr.msk.bf16.mxu1 %vm562_vm1, %v563_v12 }
   0x5   :  { %v45_v14 = vld [vmem:[%s744_s2] sm:$0x3]  ;;  %v517_v16 = vpack.c.bf16 %v60_v11, %v59_v10 }
   0x6   :  { %512 = vmatpush3.bf16.msra.mxu0 %v511_v7  ;;  %67 = vperm.xlu0 %524, %v65_v9   ;;  %v46_v15 = vcvt.s32.f32 %v45_v14 }
   0x7   :  { %513 = vmatprep.subr.bf16.mxu0 %v561_v3 }
   0x8   :  { %163 = vperm.xlu1 %525, %v46_v15  }
   0xa   :  { %515 = vmatpush3.bf16.msra.mxu0 %v514_v13 }
   0xb   :  { %516 = vmatprep.subr.bf16.mxu0 %v561_v3 }
   0xc   :  { %17 = vsyncpa [#allocation3], 0  ;;  %v61_v17 = vld [vmem:[%s745_s3 + $0x30] sm:$0xff]  ;;  %v47_v18 = vlaneseq  ;;  %vm79_vm2 = vcmask 457728   ;;  %v526_v22 = vld [vmem:[%s748_s6] sm:$0xff]   ;;  %vm191_vm5 = vcmask 261120  }
   0xd   :  { %479 = vmatpush3.bf16.msra.mxu1 %v526_v22  ;;  %v527_v23 = vld [vmem:[%s748_s6 + $0x8] sm:$0xff]   ;;  %v420_v25 = vld [vmem:[%s746_s4] ss:$0 sm:$0xff]  ;;  %v421_v26 = vld [vmem:[%s746_s4 + $0x1] ss:$0 sm:$0xff]  ;;  %vm276_vm6 = vcmask 523264  }
   0xe   :  { %518 = vmatpush3.bf16.msra.mxu0 %v517_v16  ;;  %v48_v19 = vand.u32 127, %v47_v18  ;;  %480 = vmatprep.subr.bf16.mxu1 %v563_v12  ;;  %v423_v29 = vld [vmem:[%s747_s5] ss:$0 sm:$0xff]  ;;  %v529_v37 = vld [vmem:[%s750_s8 + $0x8] sm:$0xff]   ;;  %v530_v38 = vld [vmem:[%s750_s8 + $0x10] sm:$0xff]   ;;  %s564_s24 = smov [#allocation2]  }
   0xf   :  { %473 = vmatprep.subr.mxu0 %v563_v12  ;;  %v528_v35 = vld [vmem:[%s750_s8] sm:$0xff]   ;;  %v531_v39 = vld [vmem:[%s750_s8 + $0x18] sm:$0xff]   ;;  %v533_v41 = vld [vmem:[%s752_s10 + $0x8] sm:$0xff]  }
  0x10   :  { %v532_v40 = vld [vmem:[%s752_s10] sm:$0xff]   ;;  %v534_v50 = vld [vmem:[%s752_s10 + $0x10] sm:$0xff]   ;;  %v535_v51 = vld [vmem:[%s752_s10 + $0x18] sm:$0xff]   ;;  %s411_s10 = sshll.u32 %s564_s24, 4  ;;  %s412_s10 = int_to_ptr.vmem [resolvable:$true] %s411_s10 }
  0x11   :  { %481 = vmatpush3.bf16.msra.mxu1 %v527_v23  ;;  %v424_v42 = vld [vmem:[%s749_s7] ss:$0 sm:$0xff]  ;;  %p541_p1 = scmp.lt.s32.totalorder %s412_s10, %s412_s10 }
  0x12   :  { %474 = vmatpush3.msra.mxu0 %v61_v17  ;;  %486 = vmatprep.subr.bf16.mxu1 %v563_v12  ;;  %v428_v52 = vld [vmem:[%s751_s9] ss:$0 sm:$0xff]  ;;  %s536_s9 = scalar_lea.vmem %s412_s10, 32 }
  0x13   :  { %498 = vmatprep.subr.bf16.mxu0 %v563_v12  ;;  %v434_v60 = vld [vmem:[%s753_s11] ss:$0 sm:$0xff]  ;;  %p537_p0 = scmp.ne.s32.totalorder %s412_s10, %s536_s9  ;;  %p542_p2 = scmp.lt.s32.totalorder %s536_s9, %s536_s9 }
  0x15   :  { %p543_p3 = por %p542_p2, %p541_p1 }
  0x17   :  { %p544_p4 = pnand %p543_p3, %p537_p0 }
  0x81   :  { %v51_v20 = vpop.permute.xlu0 %50 }
  0x82   :  { %vm52_vm3 = vcmp.eq.s32.totalorder %v51_v20, %v48_v19 }
  0x83   :  { %v419_v21 = vsel %vm52_vm3, 1.0, %v563_v12 }
  0x84   :  { %476 = vmatmul.mubr.msk.f32.vlgmr.msra.gmra.mrb[0].mxu0 %vm79_vm2, %v419_v21 }
  0x85   :  { %506 = vmatprep.mubr.msk.bf16.mxu0 %vm562_vm1, %v563_v12  ;;  %v68_v24 = vpop.permute.xlu0 %67  ;;  %499 = vmatpush3.bf16.msra.mxu0 %v532_v40 }
  0x86   :  { %vm69_vm4 = vcmp.eq.s32.totalorder %v68_v24, 1  ;;  %500 = vmatprep.subr.bf16.mxu0 %v563_v12 }
  0x87   :  { %v78_v27 = vsel %vm69_vm4, %v420_v25, %v421_v26  ;;  %v164_v32 = vpop.permute.xlu1 %163 }
  0x89   :  { %501 = vmatpush3.bf16.msra.mxu0 %v533_v41 }
  0x8a   :  { %502 = vmatprep.subr.bf16.mxu0 %v563_v12 }
  0x8d   :  { %503 = vmatpush3.bf16.msra.mxu0 %v534_v50 }
  0x8e   :  { %504 = vmatprep.subr.bf16.mxu0 %v563_v12 }
  0x91   :  { %505 = vmatpush3.bf16.msra.mxu0 %v535_v51 }
 0x157   :  { %v149_v28 = vpop.f32.mrb[0].mxu0 }
 0x158   :  { %v150_v30 = vadd.f32 %v149_v28, %v78_v27  ;;  %v477_v31 = vpop.f32.mrb[1].mxu0 }
 0x15a   :  { %v160_v33 = vadd.f32 %v423_v29, %v150_v30 }
 0x15c   :  { %v166_v34 = vmul.f32 %v164_v32, %v160_v33 }
 0x15e   :  { %v167_v36 = vpack.c.bf16 %v166_v34, %v166_v34 }
 0x160   :  { %483 = vmatmul.mubr.msk.bf16.vlgmr.msra.gmra.mrb[0].mxu1 %vm191_vm5, %v167_v36 }
 0x161   :  { %487 = vmatpush3.bf16.msra.mxu1 %v528_v35  ;;  %494 = vmatprep.mubr.msk.bf16.mxu1 %vm562_vm1, %v563_v12 }
 0x162   :  { %488 = vmatprep.subr.bf16.mxu1 %v563_v12 }
 0x165   :  { %489 = vmatpush3.bf16.msra.mxu1 %v529_v37 }
 0x166   :  { %490 = vmatprep.subr.bf16.mxu1 %v563_v12 }
 0x169   :  { %491 = vmatpush3.bf16.msra.mxu1 %v530_v38 }
 0x16a   :  { %492 = vmatprep.subr.bf16.mxu1 %v563_v12 }
 0x16d   :  { %493 = vmatpush3.bf16.msra.mxu1 %v531_v39 }
 0x233   :  { %v229_v43 = vpop.f32.mrb[0].mxu1 }
 0x234   :  { %v230_v44 = vadd.f32 %v424_v42, %v229_v43  ;;  %v484_v45 = vpop.f32.mrb[1].mxu1 }
 0x235   :  { %v232_v46 = vpop.f32.mrb[2].mxu1 }
 0x236   :  { %v235_v47 = vmax.f32 %v230_v44, 0.0  ;;  %v485_v48 = vpop.f32.mrb[3].mxu1 }
 0x238   :  { %v236_v49 = vpack.c.bf16 %v235_v47, %v235_v47 }
 0x23a   :  { %495 = vmatmul.mubr.msk.bf16.vlgmr.msra.gmra.mrb[4].mxu1 %vm276_vm6, %v236_v49 }
 0x30d   :  { %v314_v53 = vpop.f32.mrb[4].mxu1 }
 0x30e   :  { %v315_v54 = vadd.f32 %v428_v52, %v314_v53  ;;  %v496_v55 = vpop.f32.mrb[5].mxu1 }
 0x30f   :  { %v317_v56 = vpop.f32.mrb[6].mxu1 }
 0x310   :  { %v320_v57 = vmax.f32 %v315_v54, 0.0  ;;  %v497_v58 = vpop.f32.mrb[7].mxu1 }
 0x312   :  { %v321_v59 = vpack.c.bf16 %v320_v57, %v320_v57 }
 0x314   :  { %507 = vmatmul.mubr.msk.bf16.vlgmr.msra.gmra.mrb[4].mxu0 %vm276_vm6, %v321_v59 }
 0x3e7   :  { %v398_v61 = vpop.f32.mrb[4].mxu0 }
 0x3e8   :  { %v399_v62 = vadd.f32 %v434_v60, %v398_v61  ;;  %v508_v63 = vpop.f32.mrb[5].mxu0 }
 0x3e9   :  { %v401_v0 = vpop.f32.mrb[6].mxu0 }
 0x3ea   :  { %404 = vst [vmem:[#allocation2] sm:$0x3] %v399_v62  ;;  %v509_v1 = vpop.f32.mrb[7].mxu0 }
 0x3eb   :  { %547 = shalt.err (!%p544_p4)
}
 0x3ec   :  { %s548_s11 = scalar_lea.hbm %s754_s12, 32 }
 0x3ed   :  { %p549_p5 = scmp.ne.s32.totalorder %s754_s12, %s548_s11  ;;  %p552_p6 = scmp.lt.u32.totalorder %s548_s11, %s754_s12 }
 0x3ef   :  { %p554_p7 = pnand %p552_p6, %p549_p5 }
 0x3f1   :  { %557 = shalt.err (!%p554_p7)
}
 0x3f2   :  { %414 = dma.vmem_to_hbm [thread:$0]  %s412_s10, 32, %s754_s12, [#allocation3]  }
 0x3f3   :  { %558 = dma.done.wait [#allocation3], 32  }
 0x3f4   :  { %559 = vsyncadd [#allocation3], 4294967264 }
 0x3f5   :  { %418 = vsyncpa [#allocation3], 1 }

</bundles_post_ra>
